<compile_context>
chip_gen: v7x
topology: tpu7x:2x2x1
jax: 0.10.0
libtpu: 0.0.40
codegen_flags: <defaults>
</compile_context>

<pallas_src>
import functools

import numpy as np
import jax
import jax.numpy as jnp
from jax import lax
from jax.experimental import pallas as pl
from jax.experimental.pallas import tpu as pltpu  # noqa: F401  (kept for parity / future tiling)

BN_EPS = 1e-5   # nn.BatchNorm1d default
H_PAD = 128     # lane-dense hidden width (real channels live in [:hidden_size])
C_PAD = 128     # lane-dense classifier width (real classes in [:outputclass])
B_PAD = 8       # one f32 sublane tile (real batch rows live in [:batch])


# ---------------------------------------------------------------------------
# Single fused kernel: [Linear_overtime -> Batch_norm_overtime -> IndRNN]^L
#                      -> classifier(last time step)
# Whole problem lives in vregs; grid=() (shapes are tiny).
# Ref order: x, (w, u) * num_layers, cls_w, cls_b, out
# ---------------------------------------------------------------------------
def _fused_stacked_indrnn_kernel(T, B, num_layers, *refs):
    x_ref = refs[0]
    cls_w_ref = refs[1 + 2 * num_layers]
    cls_b_ref = refs[2 + 2 * num_layers]
    o_ref = refs[3 + 2 * num_layers]

    Hp = refs[1].shape[1]          # padded (lane-dense) hidden width
    n_inv = 1.0 / float(T * B)     # BN divisor uses the REAL row count only

    # Row mask: rows b >= B inside each timestep tile are batch padding.
    # Built once (hoisted), reused by every layer.
    row_in_step = lax.broadcasted_iota(jnp.int32, (T * B_PAD, Hp), 0) % B_PAD
    row_mask = (row_in_step < B).astype(jnp.float32)

    acts = x_ref[...]              # (T*B_PAD, Din); padded batch rows are exactly 0
    h_last = None
    for l in range(num_layers):
        w_ref = refs[1 + 2 * l]
        u_ref = refs[2 + 2 * l]

        # Linear_overtime: one 2-D MXU matmul over all (T*B_PAD) rows.
        # fc bias is dropped: with bn_location='bn_before', any per-channel
        # constant is cancelled exactly by the mean subtraction below.
        z = jnp.dot(acts, w_ref[...], preferred_element_type=jnp.float32)

        # Batch_norm_overtime (training mode): fused single-pass statistics.
        # Padded batch rows contribute 0 to both sums (their z is exactly 0),
        # so sums over all rows equal sums over real rows; divide by T*B.
        s = jnp.sum(z, axis=0, keepdims=True)
        sq = jnp.sum(z * z, axis=0, keepdims=True)
        mean = s * n_inv
        var = jnp.maximum(sq * n_inv - mean * mean, 0.0)   # biased var, clamp cancellation
        inv_std = lax.rsqrt(var + BN_EPS)
        # Re-zero padded batch rows (they would become -mean*inv_std otherwise
        # and contaminate the next layer's matmul + BN statistics).
        zn = (z - mean) * inv_std * row_mask

        # IndRNN (relu): h_t = relu(zn_t + u * h_{t-1}), h_0 = 0.
        # Fully unrolled; each per-timestep slice is one aligned (8,128) f32
        # tile and everything stays in SSA vregs (no VMEM scratch).
        u = jnp.broadcast_to(u_ref[...], (B_PAD, Hp))
        h = jnp.zeros((B_PAD, Hp), jnp.float32)
        h_ts = []
        for t in range(T):
            h = jnp.maximum(zn[t * B_PAD:(t + 1) * B_PAD, :] + u * h, 0.0)
            h_ts.append(h)
        h_last = h
        if l != num_layers - 1:
            acts = jnp.concatenate(h_ts, axis=0)   # (T*B_PAD, Hp), tile-aligned
        # args.dropout == 0.0 -> Dropout_overtime branch is skipped entirely.

    # Classifier on the last time step of the top layer; full-tile lane-dense store.
    o_ref[...] = (jnp.dot(h_last, cls_w_ref[...],
                          preferred_element_type=jnp.float32) + cls_b_ref[...])


def stacked_indrnn_forward(x, params, outputclass):
    T, B, Din = x.shape
    num_layers = len(params["layers"])
    c_pad = params["cls_w"].shape[1]

    # Pad batch to one f32 sublane tile (padded rows = 0) so every in-kernel
    # per-timestep tile and the output store are (8,128)-aligned.
    x_pad = jnp.zeros((T, B_PAD, Din), x.dtype).at[:, :B, :].set(x)
    x_flat = x_pad.reshape(T * B_PAD, Din)

    flat_args = [x_flat]
    for (w, u) in params["layers"]:
        flat_args += [w, u]
    flat_args += [params["cls_w"], params["cls_b"]]

    out_pad = pl.pallas_call(
        functools.partial(_fused_stacked_indrnn_kernel, T, B, num_layers),
        out_shape=jax.ShapeDtypeStruct((B_PAD, c_pad), jnp.float32),
    )(*flat_args)
    return out_pad[:B, :outputclass]   # strip batch/lane padding (real rows/classes)
    # TODO(synk): if scaled to realistic IndRNN configs (T~784, H~2048), switch
    # to a T/B-tiled grid with "parallel" semantics, size tiles per generation
    # (64 MiB VMEM on v7x, 256-wide MXU tiles on v6e/v7x), instead of grid=().


# ---------------------------------------------------------------------------
# Parameter initialization (mirrors stackedIndRNN_encoder.init_weights),
# zero-padded to lane-dense widths. Padded channels are mathematically inert.
# fc bias is omitted: it is init'ed to 0 and cancelled by BN (bn_before).
# ---------------------------------------------------------------------------
def init_params(key, input_size, hidden_size, num_layers, outputclass, seq_len):
    MAG = 2.0
    u_bound = float(np.power(MAG, 1.0 / seq_len))       # U_bound from the repo

    layers = []
    in_size, in_pad = input_size, input_size
    for _ in range(num_layers):
        key, k_w, k_u = jax.random.split(key, 3)
        # fc weight: kaiming_uniform_(a=8, mode='fan_in')
        gain = float(np.sqrt(2.0 / (1.0 + 8.0 ** 2)))
        bound = gain * float(np.sqrt(3.0 / in_size))
        w_real = jax.random.uniform(k_w, (in_size, hidden_size), jnp.float32,
                                    minval=-bound, maxval=bound)
        w = jnp.zeros((in_pad, H_PAD), jnp.float32)
        w = w.at[:in_size, :hidden_size].set(w_real)
        # weight_hh: uniform(0, U_bound); padded channels stay 0
        u_real = jax.random.uniform(k_u, (1, hidden_size), jnp.float32,
                                    minval=0.0, maxval=u_bound)
        u = jnp.zeros((1, H_PAD), jnp.float32).at[:, :hidden_size].set(u_real)
        layers.append((w, u))
        in_size, in_pad = hidden_size, H_PAD

    key, k_c = jax.random.split(key)
    # classifier weight: kaiming_normal_ (fan_in=hidden_size, a=0)
    std = float(np.sqrt(2.0 / hidden_size))
    cls_real = std * jax.random.normal(k_c, (hidden_size, outputclass),
                                       jnp.float32)
    cls_w = jnp.zeros((H_PAD, C_PAD), jnp.float32)
    cls_w = cls_w.at[:hidden_size, :outputclass].set(cls_real)
    cls_b = jnp.zeros((1, C_PAD), jnp.float32)
    return {"layers": layers, "cls_w": cls_w, "cls_b": cls_b}


if __name__ == "__main__":
    seq_len = 8
    batch = 2
    input_size = 16
    hidden_size = 32
    num_layers = 2
    outputclass = 10

    key = jax.random.PRNGKey(0)
    k_x, k_p = jax.random.split(key)
    x = jax.random.normal(k_x, (seq_len, batch, input_size), jnp.float32)
    params = init_params(k_p, input_size, hidden_size, num_layers,
                         outputclass, seq_len)

    fwd = jax.jit(functools.partial(stacked_indrnn_forward,
                                    outputclass=outputclass))
    out = fwd(x, params)
    jax.block_until_ready(out)
    assert out.shape == (batch, outputclass)
    assert jnp.all(jnp.isfinite(out))
    print("KERNEL_OK")
</pallas_src>

<mosaic_0001>
module attributes {stable_mosaic.version = 11 : i64} {
  func.func @_fused_stacked_indrnn_kernel(%arg0: memref<64x16xf32, #tpu.memory_space<vmem>>, %arg1: memref<16x128xf32, #tpu.memory_space<vmem>>, %arg2: memref<1x128xf32, #tpu.memory_space<vmem>>, %arg3: memref<128x128xf32, #tpu.memory_space<vmem>>, %arg4: memref<1x128xf32, #tpu.memory_space<vmem>>, %arg5: memref<128x128xf32, #tpu.memory_space<vmem>>, %arg6: memref<1x128xf32, #tpu.memory_space<vmem>>, %arg7: memref<8x128xf32, #tpu.memory_space<vmem>>) attributes {dimension_semantics = [], scalar_prefetch = 0 : i64, scratch_operands = 0 : i64, tpu.core_type = #tpu.core_type<tc>} {
    %0 = tpu.iota {dimensions = array<i32: 0>} : vector<64x128xi32>
    %c8_i32 = arith.constant 8 : i32
    %c0_i32 = arith.constant 0 : i32
    %1 = arith.cmpi eq, %c8_i32, %c0_i32 : i32
    %c1_i32 = arith.constant 1 : i32
    %2 = arith.select %1, %c1_i32, %c8_i32 : i32
    %3 = vector.broadcast %2 : i32 to vector<64x128xi32>
    %4 = arith.remsi %0, %3 : vector<64x128xi32>
    %c0_i32_0 = arith.constant 0 : i32
    %5 = vector.broadcast %c0_i32_0 : i32 to vector<64x128xi32>
    %6 = arith.cmpi ne, %4, %5 : vector<64x128xi32>
    %c0_i32_1 = arith.constant 0 : i32
    %7 = vector.broadcast %c0_i32_1 : i32 to vector<64x128xi32>
    %8 = arith.cmpi slt, %4, %7 : vector<64x128xi32>
    %c0_i32_2 = arith.constant 0 : i32
    %9 = arith.cmpi slt, %2, %c0_i32_2 : i32
    %10 = vector.broadcast %9 : i1 to vector<64x128xi1>
    %11 = vector.broadcast %10 : vector<64x128xi1> to vector<64x128xi1>
    %12 = arith.xori %8, %11 : vector<64x128xi1>
    %13 = arith.andi %12, %6 : vector<64x128xi1>
    %14 = vector.broadcast %2 : i32 to vector<64x128xi32>
    %15 = arith.addi %4, %14 : vector<64x128xi32>
    %16 = arith.select %13, %15, %4 : vector<64x128xi1>, vector<64x128xi32>
    %c2_i32 = arith.constant 2 : i32
    %17 = vector.broadcast %c2_i32 : i32 to vector<64x128xi32>
    %18 = arith.cmpi slt, %16, %17 : vector<64x128xi32>
    %19 = arith.extui %18 : vector<64x128xi1> to vector<64x128xi32>
    %20 = arith.sitofp %19 : vector<64x128xi32> to vector<64x128xf32>
    %c0 = arith.constant 0 : index
    %c0_3 = arith.constant 0 : index
    %21 = vector.load %arg0[%c0, %c0_3] : memref<64x16xf32, #tpu.memory_space<vmem>>, vector<64x16xf32>
    %c0_4 = arith.constant 0 : index
    %c0_5 = arith.constant 0 : index
    %22 = vector.load %arg1[%c0_4, %c0_5] : memref<16x128xf32, #tpu.memory_space<vmem>>, vector<16x128xf32>
    %cst = arith.constant dense<0.000000e+00> : vector<64x128xf32>
    %23 = tpu.matmul %21, %22, %cst {dimension_numbers = #tpu.dot_dimension_numbers<[1], [0], [0], [1], [0, 0, 1, 1], [], []>} : vector<64x16xf32>, vector<16x128xf32>, vector<64x128xf32> -> vector<64x128xf32>
    %cst_6 = arith.constant dense<0.000000e+00> : vector<128xf32>
    %24 = vector.multi_reduction <add>, %23, %cst_6 [0] : vector<64x128xf32> to vector<128xf32>
    %25 = vector.shape_cast %24 : vector<128xf32> to vector<1x128xf32>
    %26 = arith.mulf %23, %23 : vector<64x128xf32>
    %cst_7 = arith.constant dense<0.000000e+00> : vector<128xf32>
    %27 = vector.multi_reduction <add>, %26, %cst_7 [0] : vector<64x128xf32> to vector<128xf32>
    %28 = vector.shape_cast %27 : vector<128xf32> to vector<1x128xf32>
    %cst_8 = arith.constant 6.250000e-02 : f32
    %29 = vector.broadcast %cst_8 : f32 to vector<1x128xf32>
    %30 = arith.mulf %25, %29 : vector<1x128xf32>
    %cst_9 = arith.constant 6.250000e-02 : f32
    %31 = vector.broadcast %cst_9 : f32 to vector<1x128xf32>
    %32 = arith.mulf %28, %31 : vector<1x128xf32>
    %33 = arith.mulf %30, %30 : vector<1x128xf32>
    %34 = arith.subf %32, %33 : vector<1x128xf32>
    %cst_10 = arith.constant 0.000000e+00 : f32
    %35 = vector.broadcast %cst_10 : f32 to vector<1x128xf32>
    %36 = arith.maximumf %34, %35 : vector<1x128xf32>
    %cst_11 = arith.constant 9.99999974E-6 : f32
    %37 = vector.broadcast %cst_11 : f32 to vector<1x128xf32>
    %38 = arith.addf %36, %37 : vector<1x128xf32>
    %39 = math.rsqrt %38 : vector<1x128xf32>
    %40 = vector.broadcast %30 : vector<1x128xf32> to vector<64x128xf32>
    %41 = arith.subf %23, %40 : vector<64x128xf32>
    %42 = vector.broadcast %39 : vector<1x128xf32> to vector<64x128xf32>
    %43 = arith.mulf %41, %42 : vector<64x128xf32>
    %44 = arith.mulf %43, %20 : vector<64x128xf32>
    %c0_12 = arith.constant 0 : index
    %c0_13 = arith.constant 0 : index
    %45 = vector.load %arg2[%c0_12, %c0_13] : memref<1x128xf32, #tpu.memory_space<vmem>>, vector<1x128xf32>
    %46 = vector.shape_cast %45 : vector<1x128xf32> to vector<1x128xf32>
    %47 = vector.broadcast %46 : vector<1x128xf32> to vector<8x128xf32>
    %cst_14 = arith.constant 0.000000e+00 : f32
    %48 = vector.broadcast %cst_14 : f32 to vector<8x128xf32>
    %49 = vector.extract_strided_slice %44 {offsets = [0, 0], sizes = [8, 128], strides = [1, 1]} : vector<64x128xf32> to vector<8x128xf32>
    %50 = arith.mulf %47, %48 : vector<8x128xf32>
    %51 = arith.addf %49, %50 : vector<8x128xf32>
    %cst_15 = arith.constant 0.000000e+00 : f32
    %52 = vector.broadcast %cst_15 : f32 to vector<8x128xf32>
    %53 = arith.maximumf %51, %52 : vector<8x128xf32>
    %54 = vector.extract_strided_slice %44 {offsets = [8, 0], sizes = [8, 128], strides = [1, 1]} : vector<64x128xf32> to vector<8x128xf32>
    %55 = arith.mulf %47, %53 : vector<8x128xf32>
    %56 = arith.addf %54, %55 : vector<8x128xf32>
    %cst_16 = arith.constant 0.000000e+00 : f32
    %57 = vector.broadcast %cst_16 : f32 to vector<8x128xf32>
    %58 = arith.maximumf %56, %57 : vector<8x128xf32>
    %59 = vector.extract_strided_slice %44 {offsets = [16, 0], sizes = [8, 128], strides = [1, 1]} : vector<64x128xf32> to vector<8x128xf32>
    %60 = arith.mulf %47, %58 : vector<8x128xf32>
    %61 = arith.addf %59, %60 : vector<8x128xf32>
    %cst_17 = arith.constant 0.000000e+00 : f32
    %62 = vector.broadcast %cst_17 : f32 to vector<8x128xf32>
    %63 = arith.maximumf %61, %62 : vector<8x128xf32>
    %64 = vector.extract_strided_slice %44 {offsets = [24, 0], sizes = [8, 128], strides = [1, 1]} : vector<64x128xf32> to vector<8x128xf32>
    %65 = arith.mulf %47, %63 : vector<8x128xf32>
    %66 = arith.addf %64, %65 : vector<8x128xf32>
    %cst_18 = arith.constant 0.000000e+00 : f32
    %67 = vector.broadcast %cst_18 : f32 to vector<8x128xf32>
    %68 = arith.maximumf %66, %67 : vector<8x128xf32>
    %69 = vector.extract_strided_slice %44 {offsets = [32, 0], sizes = [8, 128], strides = [1, 1]} : vector<64x128xf32> to vector<8x128xf32>
    %70 = arith.mulf %47, %68 : vector<8x128xf32>
    %71 = arith.addf %69, %70 : vector<8x128xf32>
    %cst_19 = arith.constant 0.000000e+00 : f32
    %72 = vector.broadcast %cst_19 : f32 to vector<8x128xf32>
    %73 = arith.maximumf %71, %72 : vector<8x128xf32>
    %74 = vector.extract_strided_slice %44 {offsets = [40, 0], sizes = [8, 128], strides = [1, 1]} : vector<64x128xf32> to vector<8x128xf32>
    %75 = arith.mulf %47, %73 : vector<8x128xf32>
    %76 = arith.addf %74, %75 : vector<8x128xf32>
    %cst_20 = arith.constant 0.000000e+00 : f32
    %77 = vector.broadcast %cst_20 : f32 to vector<8x128xf32>
    %78 = arith.maximumf %76, %77 : vector<8x128xf32>
    %79 = vector.extract_strided_slice %44 {offsets = [48, 0], sizes = [8, 128], strides = [1, 1]} : vector<64x128xf32> to vector<8x128xf32>
    %80 = arith.mulf %47, %78 : vector<8x128xf32>
    %81 = arith.addf %79, %80 : vector<8x128xf32>
    %cst_21 = arith.constant 0.000000e+00 : f32
    %82 = vector.broadcast %cst_21 : f32 to vector<8x128xf32>
    %83 = arith.maximumf %81, %82 : vector<8x128xf32>
    %84 = vector.extract_strided_slice %44 {offsets = [56, 0], sizes = [8, 128], strides = [1, 1]} : vector<64x128xf32> to vector<8x128xf32>
    %85 = arith.mulf %47, %83 : vector<8x128xf32>
    %86 = arith.addf %84, %85 : vector<8x128xf32>
    %cst_22 = arith.constant 0.000000e+00 : f32
    %87 = vector.broadcast %cst_22 : f32 to vector<8x128xf32>
    %88 = arith.maximumf %86, %87 : vector<8x128xf32>
    %89 = tpu.concatenate %53, %58, %63, %68, %73, %78, %83, %88 in 0 : vector<8x128xf32>, vector<8x128xf32>, vector<8x128xf32>, vector<8x128xf32>, vector<8x128xf32>, vector<8x128xf32>, vector<8x128xf32>, vector<8x128xf32> -> vector<64x128xf32>
    %c0_23 = arith.constant 0 : index
    %c0_24 = arith.constant 0 : index
    %90 = vector.load %arg3[%c0_23, %c0_24] : memref<128x128xf32, #tpu.memory_space<vmem>>, vector<128x128xf32>
    %cst_25 = arith.constant dense<0.000000e+00> : vector<64x128xf32>
    %91 = tpu.matmul %89, %90, %cst_25 {dimension_numbers = #tpu.dot_dimension_numbers<[1], [0], [0], [1], [0, 0, 1, 1], [], []>} : vector<64x128xf32>, vector<128x128xf32>, vector<64x128xf32> -> vector<64x128xf32>
    %cst_26 = arith.constant dense<0.000000e+00> : vector<128xf32>
    %92 = vector.multi_reduction <add>, %91, %cst_26 [0] : vector<64x128xf32> to vector<128xf32>
    %93 = vector.shape_cast %92 : vector<128xf32> to vector<1x128xf32>
    %94 = arith.mulf %91, %91 : vector<64x128xf32>
    %cst_27 = arith.constant dense<0.000000e+00> : vector<128xf32>
    %95 = vector.multi_reduction <add>, %94, %cst_27 [0] : vector<64x128xf32> to vector<128xf32>
    %96 = vector.shape_cast %95 : vector<128xf32> to vector<1x128xf32>
    %cst_28 = arith.constant 6.250000e-02 : f32
    %97 = vector.broadcast %cst_28 : f32 to vector<1x128xf32>
    %98 = arith.mulf %93, %97 : vector<1x128xf32>
    %cst_29 = arith.constant 6.250000e-02 : f32
    %99 = vector.broadcast %cst_29 : f32 to vector<1x128xf32>
    %100 = arith.mulf %96, %99 : vector<1x128xf32>
    %101 = arith.mulf %98, %98 : vector<1x128xf32>
    %102 = arith.subf %100, %101 : vector<1x128xf32>
    %cst_30 = arith.constant 0.000000e+00 : f32
    %103 = vector.broadcast %cst_30 : f32 to vector<1x128xf32>
    %104 = arith.maximumf %102, %103 : vector<1x128xf32>
    %cst_31 = arith.constant 9.99999974E-6 : f32
    %105 = vector.broadcast %cst_31 : f32 to vector<1x128xf32>
    %106 = arith.addf %104, %105 : vector<1x128xf32>
    %107 = math.rsqrt %106 : vector<1x128xf32>
    %108 = vector.broadcast %98 : vector<1x128xf32> to vector<64x128xf32>
    %109 = arith.subf %91, %108 : vector<64x128xf32>
    %110 = vector.broadcast %107 : vector<1x128xf32> to vector<64x128xf32>
    %111 = arith.mulf %109, %110 : vector<64x128xf32>
    %112 = arith.mulf %111, %20 : vector<64x128xf32>
    %c0_32 = arith.constant 0 : index
    %c0_33 = arith.constant 0 : index
    %113 = vector.load %arg4[%c0_32, %c0_33] : memref<1x128xf32, #tpu.memory_space<vmem>>, vector<1x128xf32>
    %114 = vector.shape_cast %113 : vector<1x128xf32> to vector<1x128xf32>
    %115 = vector.broadcast %114 : vector<1x128xf32> to vector<8x128xf32>
    %cst_34 = arith.constant 0.000000e+00 : f32
    %116 = vector.broadcast %cst_34 : f32 to vector<8x128xf32>
    %117 = vector.extract_strided_slice %112 {offsets = [0, 0], sizes = [8, 128], strides = [1, 1]} : vector<64x128xf32> to vector<8x128xf32>
    %118 = arith.mulf %115, %116 : vector<8x128xf32>
    %119 = arith.addf %117, %118 : vector<8x128xf32>
    %cst_35 = arith.constant 0.000000e+00 : f32
    %120 = vector.broadcast %cst_35 : f32 to vector<8x128xf32>
    %121 = arith.maximumf %119, %120 : vector<8x128xf32>
    %122 = vector.extract_strided_slice %112 {offsets = [8, 0], sizes = [8, 128], strides = [1, 1]} : vector<64x128xf32> to vector<8x128xf32>
    %123 = arith.mulf %115, %121 : vector<8x128xf32>
    %124 = arith.addf %122, %123 : vector<8x128xf32>
    %cst_36 = arith.constant 0.000000e+00 : f32
    %125 = vector.broadcast %cst_36 : f32 to vector<8x128xf32>
    %126 = arith.maximumf %124, %125 : vector<8x128xf32>
    %127 = vector.extract_strided_slice %112 {offsets = [16, 0], sizes = [8, 128], strides = [1, 1]} : vector<64x128xf32> to vector<8x128xf32>
    %128 = arith.mulf %115, %126 : vector<8x128xf32>
    %129 = arith.addf %127, %128 : vector<8x128xf32>
    %cst_37 = arith.constant 0.000000e+00 : f32
    %130 = vector.broadcast %cst_37 : f32 to vector<8x128xf32>
    %131 = arith.maximumf %129, %130 : vector<8x128xf32>
    %132 = vector.extract_strided_slice %112 {offsets = [24, 0], sizes = [8, 128], strides = [1, 1]} : vector<64x128xf32> to vector<8x128xf32>
    %133 = arith.mulf %115, %131 : vector<8x128xf32>
    %134 = arith.addf %132, %133 : vector<8x128xf32>
    %cst_38 = arith.constant 0.000000e+00 : f32
    %135 = vector.broadcast %cst_38 : f32 to vector<8x128xf32>
    %136 = arith.maximumf %134, %135 : vector<8x128xf32>
    %137 = vector.extract_strided_slice %112 {offsets = [32, 0], sizes = [8, 128], strides = [1, 1]} : vector<64x128xf32> to vector<8x128xf32>
    %138 = arith.mulf %115, %136 : vector<8x128xf32>
    %139 = arith.addf %137, %138 : vector<8x128xf32>
    %cst_39 = arith.constant 0.000000e+00 : f32
    %140 = vector.broadcast %cst_39 : f32 to vector<8x128xf32>
    %141 = arith.maximumf %139, %140 : vector<8x128xf32>
    %142 = vector.extract_strided_slice %112 {offsets = [40, 0], sizes = [8, 128], strides = [1, 1]} : vector<64x128xf32> to vector<8x128xf32>
    %143 = arith.mulf %115, %141 : vector<8x128xf32>
    %144 = arith.addf %142, %143 : vector<8x128xf32>
    %cst_40 = arith.constant 0.000000e+00 : f32
    %145 = vector.broadcast %cst_40 : f32 to vector<8x128xf32>
    %146 = arith.maximumf %144, %145 : vector<8x128xf32>
    %147 = vector.extract_strided_slice %112 {offsets = [48, 0], sizes = [8, 128], strides = [1, 1]} : vector<64x128xf32> to vector<8x128xf32>
    %148 = arith.mulf %115, %146 : vector<8x128xf32>
    %149 = arith.addf %147, %148 : vector<8x128xf32>
    %cst_41 = arith.constant 0.000000e+00 : f32
    %150 = vector.broadcast %cst_41 : f32 to vector<8x128xf32>
    %151 = arith.maximumf %149, %150 : vector<8x128xf32>
    %152 = vector.extract_strided_slice %112 {offsets = [56, 0], sizes = [8, 128], strides = [1, 1]} : vector<64x128xf32> to vector<8x128xf32>
    %153 = arith.mulf %115, %151 : vector<8x128xf32>
    %154 = arith.addf %152, %153 : vector<8x128xf32>
    %cst_42 = arith.constant 0.000000e+00 : f32
    %155 = vector.broadcast %cst_42 : f32 to vector<8x128xf32>
    %156 = arith.maximumf %154, %155 : vector<8x128xf32>
    %c0_43 = arith.constant 0 : index
    %c0_44 = arith.constant 0 : index
    %157 = vector.load %arg5[%c0_43, %c0_44] : memref<128x128xf32, #tpu.memory_space<vmem>>, vector<128x128xf32>
    %cst_45 = arith.constant dense<0.000000e+00> : vector<8x128xf32>
    %158 = tpu.matmul %156, %157, %cst_45 {dimension_numbers = #tpu.dot_dimension_numbers<[1], [0], [0], [1], [0, 0, 1, 1], [], []>} : vector<8x128xf32>, vector<128x128xf32>, vector<8x128xf32> -> vector<8x128xf32>
    %c0_46 = arith.constant 0 : index
    %c0_47 = arith.constant 0 : index
    %159 = vector.load %arg6[%c0_46, %c0_47] : memref<1x128xf32, #tpu.memory_space<vmem>>, vector<1x128xf32>
    %160 = vector.broadcast %159 : vector<1x128xf32> to vector<8x128xf32>
    %161 = arith.addf %158, %160 : vector<8x128xf32>
    %c0_48 = arith.constant 0 : index
    %c0_49 = arith.constant 0 : index
    %162 = vector.load %arg7[%c0_48, %c0_49] : memref<8x128xf32, #tpu.memory_space<vmem>>, vector<8x128xf32>
    tpu.vector_store %arg7[%c0_48, %c0_49], %161 {strides = array<i32>} : memref<8x128xf32, #tpu.memory_space<vmem>>, vector<8x128xf32>,
    return
  }
}

</mosaic_0001>

<bundles_post_ra>
// kernel: stacked_indrnn_forward.1
= control target key start
LH: loop header
LB: loop body
LE: loop exit
PB: predicated region body
PF: predicated region fallthrough
CT: control target
= control target key end

     0   :  { %12 = vsyncpa [#allocation3], 0  ;;  %s1222_s0 = inlined_call_operand.vmem [shape: f32[64,16], index: 0, kind: input, shape index: {}]   ;;  %s1223_s1 = inlined_call_operand.vmem [shape: f32[16,128], index: 1, kind: input, shape index: {}]   ;;  %s1224_s2 = inlined_call_operand.vmem [shape: f32[1,128], index: 2, kind: input, shape index: {}]   ;;  %s1225_s3 = inlined_call_operand.hbm [shape: f32[128,128], index: 3, kind: input, shape index: {}]   ;;  %s1226_s4 = inlined_call_operand.vmem [shape: f32[1,128], index: 4, kind: input, shape index: {}]   ;;  %s1227_s5 = inlined_call_operand.hbm [shape: f32[128,128], index: 5, kind: input, shape index: {}]   ;;  %s1228_s6 = inlined_call_operand.vmem [shape: f32[1,128], index: 6, kind: input, shape index: {}]   ;;  %s1229_s7 = inlined_call_operand.vmem [shape: f32[8,128], index: 7, kind: output, shape index: {}]  }
   0x1   :  { %13 = vsyncpa [#allocation5], 0  ;;  %s1020_s24 = smov [#allocation2]   ;;  %s972_s28 = scalar_lea.hbm %s1225_s3, 2048 }
   0x2   :  { %s25_s25 = sshll.u32 %s1020_s24, 4  ;;  %p973_p0 = scmp.ne.s32.totalorder %s1225_s3, %s972_s28  ;;  %s26_s25 = int_to_ptr.vmem [resolvable:$true] %s25_s25 }
   0x3   :  { %p976_p1 = scmp.lt.u32.totalorder %s972_s28, %s1225_s3 }
   0x5   :  { %p978_p2 = pnand %p976_p1, %p973_p0 }
   0x7   :  { %981 = shalt.err (!%p978_p2)
}
   0x8   :  { %s982_s10 = scalar_lea.vmem %s26_s25, 2048  ;;  %p987_p4 = scmp.lt.s32.totalorder %s26_s25, %s26_s25 }
   0x9   :  { %p983_p3 = scmp.ne.s32.totalorder %s26_s25, %s982_s10  ;;  %p988_p5 = scmp.lt.s32.totalorder %s982_s10, %s982_s10 }
   0xb   :  { %p989_p6 = por %p988_p5, %p987_p4 }
   0xd   :  { %p990_p7 = pnand %p989_p6, %p983_p3 }
   0xf   :  { %993 = shalt.err (!%p990_p7)
}
  0x10   :  { %s1021_s11 = smov 128   ;;  %s1022_s12 = smov 8  }
  0x11   :  { %31 = dma.hbm_to_vmem [thread:$0]  %s1225_s3, 2048, %s26_s25, [#allocation3], %s1021_s11, %s1021_s11, %s1022_s12  }
  0x12   :  { %s1023_s15 = smov [#allocation4]   ;;  %s994_s19 = scalar_lea.hbm %s1227_s5, 2048 }
  0x13   :  { %s39_s16 = sshll.u32 %s1023_s15, 4  ;;  %p995_p8 = scmp.ne.s32.totalorder %s1227_s5, %s994_s19  ;;  %s40_s16 = int_to_ptr.vmem [resolvable:$true] %s39_s16 }
  0x14   :  { %p998_p9 = scmp.lt.u32.totalorder %s994_s19, %s1227_s5 }
  0x16   :  { %p1000_p10 = pnand %p998_p9, %p995_p8 }
  0x18   :  { %1003 = shalt.err (!%p1000_p10)
}
  0x19   :  { %s1004_s24 = scalar_lea.vmem %s40_s16, 2048  ;;  %p1009_p12 = scmp.lt.s32.totalorder %s40_s16, %s40_s16 }
  0x1a   :  { %p1005_p11 = scmp.ne.s32.totalorder %s40_s16, %s1004_s24  ;;  %p1010_p13 = scmp.lt.s32.totalorder %s1004_s24, %s1004_s24 }
  0x1c   :  { %p1011_p0 = por %p1010_p13, %p1009_p12 }
  0x1e   :  { %p1012_p1 = pnand %p1011_p0, %p1005_p11 }
  0x20   :  { %1015 = shalt.err (!%p1012_p1)
}
  0x21   :  { %45 = dma.hbm_to_vmem [thread:$0]  %s1227_s5, 2048, %s40_s16, [#allocation5], %s1021_s11, %s1021_s11, %s1022_s12  }
  0x22   :  { %1016 = dma.done.wait [#allocation3], 2048  }
  0x23   :  { %1017 = vsyncadd [#allocation3], 4294965248 }
  0x24   :  { %1018 = dma.done.wait [#allocation5], 2048  }
  0x25   :  { %1019 = vsyncadd [#allocation5], 4294965248  ;;  %vm193_vm0 = vcmask 130048   ;;  %v191_v0 = vld [vmem:[%s1223_s1] sm:$0xff]  ;;  %v192_v1 = vld [vmem:[%s1223_s1 + $0x8] sm:$0xff]  ;;  %vm1026_vm9 = vmmov 0  }
  0x26   :  { %v183_v2 = vld [vmem:[%s1222_s0] sm:$0xff]  ;;  %v901_v3 = vpack.c.bf16 %v192_v1, %v191_v0  ;;  %v184_v4 = vld [vmem:[%s1222_s0 + $0x8] sm:$0xff]  ;;  %v185_v5 = vld [vmem:[%s1222_s0 + $0x10] sm:$0xff] }
  0x27   :  { %810 = vmatprep.mubr.msk.f32.mxu0 %vm193_vm0, %v183_v2  ;;  %v186_v6 = vld [vmem:[%s1222_s0 + $0x18] sm:$0xff]  ;;  %v187_v7 = vld [vmem:[%s1222_s0 + $0x20] sm:$0xff]  ;;  %v188_v8 = vld [vmem:[%s1222_s0 + $0x28] sm:$0xff] }
  0x28   :  { %902 = vmatprep.subr.bf16.mxu0 %v901_v3  ;;  %v189_v9 = vld [vmem:[%s1222_s0 + $0x30] sm:$0xff]  ;;  %v190_v10 = vld [vmem:[%s1222_s0 + $0x38] sm:$0xff]  ;;  %v419_v11 = vld [vmem:[#allocation2] sm:$0xff] }
  0x29   :  { %904 = vmatpush3.bf16.msra.mxu0 %v901_v3  ;;  %v420_v12 = vld [vmem:[#allocation2 + $0x8] sm:$0xff]  ;;  %v421_v14 = vld [vmem:[#allocation2 + $0x10] sm:$0xff]  ;;  %v422_v15 = vld [vmem:[#allocation2 + $0x18] sm:$0xff] }
  0x2a   :  { %v905_v13 = vpack.c.bf16 %v420_v12, %v419_v11  ;;  %v909_v16 = vpack.c.bf16 %v422_v15, %v421_v14  ;;  %v423_v17 = vld [vmem:[#allocation2 + $0x20] sm:$0xff]  ;;  %v424_v18 = vld [vmem:[#allocation2 + $0x28] sm:$0xff]  ;;  %v425_v20 = vld [vmem:[#allocation2 + $0x30] sm:$0xff] }
  0x2b   :  { %v913_v19 = vpack.c.bf16 %v424_v18, %v423_v17  ;;  %v426_v21 = vld [vmem:[#allocation2 + $0x38] sm:$0xff]  ;;  %v427_v23 = vld [vmem:[#allocation2 + $0x40] sm:$0xff]  ;;  %v428_v24 = vld [vmem:[#allocation2 + $0x48] sm:$0xff] }
  0x2c   :  { %811 = vmatmul.mubr.msk.f32.vlgmr.msra.gmra.mrb[0].mxu0 %vm193_vm0, %v184_v4  ;;  %906 = vmatprep.subr.bf16.mxu1 %v905_v13  ;;  %v917_v22 = vpack.c.bf16 %v426_v21, %v425_v20  ;;  %v921_v25 = vpack.c.bf16 %v428_v24, %v427_v23  ;;  %v429_v26 = vld [vmem:[#allocation2 + $0x50] sm:$0xff]  ;;  %v430_v27 = vld [vmem:[#allocation2 + $0x58] sm:$0xff]  ;;  %v431_v29 = vld [vmem:[#allocation2 + $0x60] sm:$0xff] }
  0x2d   :  { %813 = vmatprep.mubr.msk.f32.mxu0 %vm193_vm0, %v185_v5  ;;  %908 = vmatpush3.bf16.msra.mxu1 %v905_v13  ;;  %v925_v28 = vpack.c.bf16 %v430_v27, %v429_v26  ;;  %v432_v30 = vld [vmem:[#allocation2 + $0x68] sm:$0xff]  ;;  %v433_v32 = vld [vmem:[#allocation2 + $0x70] sm:$0xff]  ;;  %v434_v33 = vld [vmem:[#allocation2 + $0x78] sm:$0xff]  ;;  %v54_v26 = vlaneseq }
  0x2e   :  { %910 = vmatprep.subr.bf16.mxu1 %v909_v16  ;;  %v929_v31 = vpack.c.bf16 %v432_v30, %v431_v29  ;;  %v933_v34 = vpack.c.bf16 %v434_v33, %v433_v32 }
  0x30   :  { %814 = vmatmul.mubr.msk.f32.gmra.mrb[2].mxu0 %vm193_vm0, %v186_v6 }
  0x31   :  { %816 = vmatprep.mubr.msk.f32.mxu0 %vm193_vm0, %v187_v7  ;;  %912 = vmatpush3.bf16.msra.mxu1 %v909_v16 }
  0x32   :  { %914 = vmatprep.subr.bf16.mxu1 %v913_v19 }
  0x34   :  { %817 = vmatmul.mubr.msk.f32.gmra.mrb[4].mxu0 %vm193_vm0, %v188_v8 }
  0x35   :  { %819 = vmatprep.mubr.msk.f32.mxu0 %vm193_vm0, %v189_v9  ;;  %916 = vmatpush3.bf16.msra.mxu1 %v913_v19 }
  0x36   :  { %918 = vmatprep.subr.bf16.mxu1 %v917_v22 }
  0x38   :  { %820 = vmatmul.mubr.msk.f32.gmra.mrb[6].mxu0 %vm193_vm0, %v190_v10 }
  0x39   :  { %920 = vmatpush3.bf16.msra.mxu1 %v917_v22 }
  0x3a   :  { %922 = vmatprep.subr.bf16.mxu1 %v921_v25 }
  0x3d   :  { %924 = vmatpush3.bf16.msra.mxu1 %v921_v25 }
  0x3e   :  { %926 = vmatprep.subr.bf16.mxu1 %v925_v28 }
  0x41   :  { %928 = vmatpush3.bf16.msra.mxu1 %v925_v28  ;;  %v55_v28 = vshrl.u32 %v54_v26, 7 }
  0x42   :  { %930 = vmatprep.subr.bf16.mxu1 %v929_v31 }
  0x43   :  { %v67_v29 = vand.u32 7, %v55_v28  ;;  %v56_v30 = vadd.s32 8, %v55_v28 }
  0x45   :  { %932 = vmatpush3.bf16.msra.mxu1 %v929_v31  ;;  %vm159_vm1 = vcmp.lt.s32.totalorder %v67_v29, 2  ;;  %v1162_v31 = vld [vmem:[%s1224_s2] ss:$0 sm:$0xff]  ;;  %v74_v32 = vand.u32 7, %v56_v30 }
  0x46   :  { %934 = vmatprep.subr.bf16.mxu1 %v933_v34 }
  0x47   :  { %vm160_vm2 = vcmp.lt.s32.totalorder %v74_v32, 2  ;;  %v636_v32 = vld [vmem:[#allocation4] sm:$0xff] }
  0x49   :  { %936 = vmatpush3.bf16.msra.mxu1 %v933_v34  ;;  %v1024_v34 = vmov 0.0  }
  0x4a   :  { %898 = vmatprep.mubr.msk.f32.mxu0 %vm1026_vm9, %v1024_v34 }
  0xff   :  { %v1129_v35 = vpop.f32.mrb[0].mxu0 }
 0x100   :  { %v337_v36 = vmul.f32 %v1129_v35, %v1129_v35  ;;  %v1133_v37 = vpop.f32.mrb[1].mxu0 }
 0x101   :  { %v323_v38 = vadd.f32 %v1129_v35, %v1133_v37  ;;  %v336_v39 = vmul.f32 %v1133_v37, %v1133_v37 }
 0x103   :  { %v344_v40 = vadd.f32 %v337_v36, %v336_v39  ;;  %v1139_v41 = vpop.f32.mrb[2].mxu0  ;;  %v395_v36 = vmul.f32 0.0, %v1162_v31 }
 0x104   :  { %v1141_v42 = vpop.f32.mrb[3].mxu0  ;;  %v339_v45 = vmul.f32 %v1139_v41, %v1139_v41 }
 0x105   :  { %v324_v43 = vadd.f32 %v323_v38, %v1141_v42  ;;  %v338_v44 = vmul.f32 %v1141_v42, %v1141_v42 }
 0x107   :  { %v345_v46 = vadd.f32 %v344_v40, %v338_v44  ;;  %v1148_v47 = vpop.f32.mrb[4].mxu0  ;;  %v325_v48 = vadd.f32 %v1139_v41, %v324_v43 }
 0x108   :  { %v304_v49 = vpop.f32.mrb[5].mxu0  ;;  %v341_v53 = vmul.f32 %v1148_v47, %v1148_v47 }
 0x109   :  { %v326_v50 = vadd.f32 %v325_v48, %v304_v49  ;;  %v340_v51 = vmul.f32 %v304_v49, %v304_v49  ;;  %v346_v52 = vadd.f32 %v345_v46, %v339_v45 }
 0x10b   :  { %v347_v54 = vadd.f32 %v346_v52, %v340_v51  ;;  %v821_v55 = vpop.f32.mrb[6].mxu0  ;;  %v327_v56 = vadd.f32 %v1148_v47, %v326_v50  ;;  %v58_v51 = vadd.s32 24, %v55_v28 }
 0x10c   :  { %v314_v57 = vpop.f32.mrb[7].mxu0  ;;  %v343_v61 = vmul.f32 %v821_v55, %v821_v55 }
 0x10d   :  { %v328_v58 = vadd.f32 %v327_v56, %v314_v57  ;;  %v342_v59 = vmul.f32 %v314_v57, %v314_v57  ;;  %v348_v60 = vadd.f32 %v347_v54, %v341_v53 }
 0x10f   :  { %v329_v62 = vadd.f32 %v821_v55, %v328_v58  ;;  %v349_v63 = vadd.f32 %v348_v60, %v342_v59  ;;  %v59_v58 = vadd.s32 32, %v55_v28 }
 0x111   :  { %v330_v0 = vrot.slane %v329_v62, 4  ;;  %v350_v1 = vadd.f32 %v349_v63, %v343_v61 }
 0x113   :  { %v331_v2 = vadd.f32 %v330_v0, %v329_v62  ;;  %v351_v3 = vrot.slane %v350_v1, 4  ;;  %v95_v62 = vand.u32 7, %v59_v58  ;;  %v651_v58 = vld [vmem:[#allocation4 + $0x78] sm:$0xff] }
 0x115   :  { %v332_v4 = vrot.slane %v331_v2, 2  ;;  %v352_v5 = vadd.f32 %v351_v3, %v350_v1  ;;  %v60_v1 = vadd.s32 40, %v55_v28  ;;  %vm163_vm5 = vcmp.lt.s32.totalorder %v95_v62, 2 }
 0x117   :  { %v333_v6 = vadd.f32 %v332_v4, %v331_v2  ;;  %v353_v7 = vrot.slane %v352_v5, 2 }
 0x119   :  { %v334_v8 = vrot.slane %v333_v6, 1  ;;  %v354_v9 = vadd.f32 %v353_v7, %v352_v5  ;;  %v102_v5 = vand.u32 7, %v60_v1 }
 0x11b   :  { %v335_v10 = vadd.f32 %v334_v8, %v333_v6  ;;  %v355_v11 = vrot.slane %v354_v9, 1  ;;  %v1185_v6 = vsel %vm163_vm5, 1.0, %v1024_v34  ;;  %v61_v8 = vadd.s32 48, %v55_v28 }
 0x11c   :  { %vm164_vm6 = vcmp.lt.s32.totalorder %v102_v5, 2 }
 0x11d   :  { %v356_v12 = vadd.f32 %v355_v11, %v354_v9  ;;  %v357_v13 = vmul.f32 0.0625, %v335_v10 }
 0x11f   :  { %v358_v14 = vmul.f32 0.0625, %v356_v12  ;;  %v359_v15 = vmul.f32 %v357_v13, %v357_v13  ;;  %v370_v16 = vsub.f32 %v314_v57, %v357_v13  ;;  %v364_v17 = vsub.f32 %v1133_v37, %v357_v13 }
 0x120   :  { %v365_v18 = vsub.f32 %v1129_v35, %v357_v13  ;;  %v366_v19 = vsub.f32 %v1141_v42, %v357_v13  ;;  %v367_v20 = vsub.f32 %v1139_v41, %v357_v13  ;;  %v368_v21 = vsub.f32 %v304_v49, %v357_v13 }
 0x121   :  { %v360_v22 = vsub.f32 %v358_v14, %v359_v15  ;;  %v369_v23 = vsub.f32 %v1148_v47, %v357_v13  ;;  %v371_v24 = vsub.f32 %v821_v55, %v357_v13  ;;  %v1165_v35 = vsel %vm159_vm1, 1.0, %v1024_v34 }
 0x122   :  { %v57_v37 = vadd.s32 16, %v55_v28  ;;  %v1170_v49 = vsel %vm160_vm2, 1.0, %v1024_v34  ;;  %v88_v55 = vand.u32 7, %v58_v51  ;;  %v109_v12 = vand.u32 7, %v61_v8  ;;  %v647_v51 = vld [vmem:[#allocation4 + $0x58] sm:$0xff] }
 0x123   :  { %v361_v25 = vmax.f32 %v360_v22, 0.0  ;;  %v1190_v13 = vsel %vm164_vm6, 1.0, %v1024_v34  ;;  %v62_v15 = vadd.s32 56, %v55_v28 }
 0x124   :  { %v81_v48 = vand.u32 7, %v57_v37  ;;  %vm162_vm4 = vcmp.lt.s32.totalorder %v88_v55, 2  ;;  %vm165_vm7 = vcmp.lt.s32.totalorder %v109_v12, 2  ;;  %v1025_v37 = vmov 0.0|0.0  }
 0x125   :  { %v362_v27 = vadd.f32 1e-05, %v361_v25  ;;  %v1180_v63 = vsel %vm162_vm4, 1.0, %v1024_v34  ;;  %937 = vmatprep.subr.bf16.mxu0 %v1025_v37 }
 0x126   :  { %vm161_vm3 = vcmp.lt.s32.totalorder %v81_v48, 2 }
 0x127   :  { %968 = vrsqrt.f32 %v362_v27  ;;  %v1175_v56 = vsel %vm161_vm3, 1.0, %v1024_v34 }
 0x131   :  { %v969_v33 = vpop.eup %968 }
 0x132   :  { %v378_v38 = vmul.f32 %v969_v33, %v370_v16  ;;  %v372_v39 = vmul.f32 %v969_v33, %v364_v17  ;;  %v373_v40 = vmul.f32 %v969_v33, %v365_v18  ;;  %v374_v41 = vmul.f32 %v969_v33, %v366_v19 }
 0x133   :  { %v375_v42 = vmul.f32 %v969_v33, %v367_v20  ;;  %v376_v43 = vmul.f32 %v969_v33, %v368_v21  ;;  %v377_v44 = vmul.f32 %v969_v33, %v369_v23  ;;  %v379_v45 = vmul.f32 %v969_v33, %v371_v24  ;;  %v637_v33 = vld [vmem:[#allocation4 + $0x8] sm:$0xff] }
 0x134   :  { %v380_v46 = vmul.f32 %v1165_v35, %v372_v39  ;;  %v381_v53 = vmul.f32 %v1170_v49, %v373_v40  ;;  %v382_v60 = vmul.f32 %v1175_v56, %v374_v41  ;;  %v116_v19 = vand.u32 7, %v62_v15  ;;  %v639_v39 = vld [vmem:[#allocation4 + $0x18] sm:$0xff]  ;;  %v640_v41 = vld [vmem:[#allocation4 + $0x20] sm:$0xff] }
 0x135   :  { %v383_v3 = vmul.f32 %v1180_v63, %v375_v42  ;;  %v384_v10 = vmul.f32 %v1185_v6, %v376_v43  ;;  %v385_v17 = vmul.f32 %v1190_v13, %v377_v44  ;;  %v1195_v20 = vsel %vm165_vm7, 1.0, %v1024_v34  ;;  %v642_v43 = vld [vmem:[#allocation4 + $0x30] sm:$0xff]  ;;  %v643_v44 = vld [vmem:[#allocation4 + $0x38] sm:$0xff] }
 0x136   :  { %v396_v47 = vadd.f32 %v395_v36, %v380_v46  ;;  %v386_v23 = vmul.f32 %v1195_v20, %v378_v38  ;;  %vm166_vm8 = vcmp.lt.s32.totalorder %v116_v19, 2  ;;  %v938_v36 = vpack.c.bf16 %v637_v33, %v636_v32  ;;  %v638_v38 = vld [vmem:[#allocation4 + $0x10] sm:$0xff]  ;;  %v644_v46 = vld [vmem:[#allocation4 + $0x40] sm:$0xff] }
 0x137   :  { %v1200_v25 = vsel %vm166_vm8, 1.0, %v1024_v34  ;;  %v941_v40 = vpack.c.bf16 %v639_v39, %v638_v38 }
 0x138   :  { %v397_v50 = vmax.f32 %v396_v47, 0.0  ;;  %v387_v28 = vmul.f32 %v1200_v25, %v379_v45  ;;  %939 = vmatpush3.bf16.msra.mxu0 %v938_v36  ;;  %v947_v45 = vpack.c.bf16 %v643_v44, %v642_v43  ;;  %v645_v47 = vld [vmem:[#allocation4 + $0x48] sm:$0xff] }
 0x139   :  { %940 = vmatprep.subr.bf16.mxu0 %v1025_v37  ;;  %v950_v48 = vpack.c.bf16 %v645_v47, %v644_v46 }
 0x13a   :  { %v398_v52 = vmul.f32 %v1162_v31, %v397_v50  ;;  %854 = vmatprep.mubr.f32.mxu1 %v397_v50  ;;  %v646_v50 = vld [vmem:[#allocation4 + $0x50] sm:$0xff] }
 0x13c   :  { %v399_v54 = vadd.f32 %v398_v52, %v381_v53  ;;  %942 = vmatpush3.bf16.msra.mxu0 %v941_v40  ;;  %v953_v52 = vpack.c.bf16 %v647_v51, %v646_v50  ;;  %v648_v53 = vld [vmem:[#allocation4 + $0x60] sm:$0xff] }
 0x13d   :  { %943 = vmatprep.subr.bf16.mxu0 %v1025_v37 }
 0x13e   :  { %v400_v57 = vmax.f32 %v399_v54, 0.0  ;;  %v649_v54 = vld [vmem:[#allocation4 + $0x68] sm:$0xff] }
 0x13f   :  { %v956_v55 = vpack.c.bf16 %v649_v54, %v648_v53 }
 0x140   :  { %v401_v59 = vmul.f32 %v1162_v31, %v400_v57  ;;  %855 = vmatmul.mubr.f32.vlgmr.msra.gmra.mrb[0].mxu1 %v400_v57  ;;  %v650_v57 = vld [vmem:[#allocation4 + $0x70] sm:$0xff] }
 0x142   :  { %v402_v61 = vadd.f32 %v401_v59, %v382_v60  ;;  %v959_v59 = vpack.c.bf16 %v651_v58, %v650_v57 }
 0x144   :  { %v403_v0 = vmax.f32 %v402_v61, 0.0 }
 0x146   :  { %v404_v2 = vmul.f32 %v1162_v31, %v403_v0  ;;  %857 = vmatprep.mubr.f32.mxu1 %v403_v0 }
 0x148   :  { %v405_v4 = vadd.f32 %v404_v2, %v383_v3 }
 0x14a   :  { %v406_v7 = vmax.f32 %v405_v4, 0.0 }
 0x14c   :  { %v407_v9 = vmul.f32 %v1162_v31, %v406_v7  ;;  %858 = vmatmul.mubr.f32.gmra.mrb[2].mxu1 %v406_v7 }
 0x14e   :  { %v408_v11 = vadd.f32 %v407_v9, %v384_v10 }
 0x150   :  { %v409_v14 = vmax.f32 %v408_v11, 0.0 }
 0x152   :  { %v410_v16 = vmul.f32 %v1162_v31, %v409_v14  ;;  %860 = vmatprep.mubr.f32.mxu1 %v409_v14 }
 0x154   :  { %v411_v18 = vadd.f32 %v410_v16, %v385_v17 }
 0x156   :  { %v412_v21 = vmax.f32 %v411_v18, 0.0 }
 0x158   :  { %v413_v22 = vmul.f32 %v1162_v31, %v412_v21  ;;  %861 = vmatmul.mubr.f32.gmra.mrb[4].mxu1 %v412_v21 }
 0x15a   :  { %v414_v24 = vadd.f32 %v413_v22, %v386_v23 }
 0x15c   :  { %v415_v26 = vmax.f32 %v414_v24, 0.0 }
 0x15e   :  { %v416_v27 = vmul.f32 %v1162_v31, %v415_v26  ;;  %863 = vmatprep.mubr.f32.mxu1 %v415_v26  ;;  %v641_v31 = vld [vmem:[#allocation4 + $0x28] sm:$0xff] }
 0x15f   :  { %v944_v42 = vpack.c.bf16 %v641_v31, %v640_v41 }
 0x160   :  { %v417_v29 = vadd.f32 %v416_v27, %v387_v28 }
 0x161   :  { %945 = vmatpush3.bf16.msra.mxu0 %v944_v42 }
 0x162   :  { %v418_v30 = vmax.f32 %v417_v29, 0.0  ;;  %946 = vmatprep.subr.bf16.mxu0 %v1025_v37 }
 0x164   :  { %864 = vmatmul.mubr.f32.gmra.mrb[6].mxu1 %v418_v30 }
 0x165   :  { %948 = vmatpush3.bf16.msra.mxu0 %v947_v45 }
 0x166   :  { %949 = vmatprep.subr.bf16.mxu0 %v1025_v37 }
 0x169   :  { %951 = vmatpush3.bf16.msra.mxu0 %v950_v48 }
 0x16a   :  { %952 = vmatprep.subr.bf16.mxu0 %v1025_v37 }
 0x16d   :  { %954 = vmatpush3.bf16.msra.mxu0 %v953_v52 }
 0x16e   :  { %955 = vmatprep.subr.bf16.mxu0 %v1025_v37 }
 0x171   :  { %957 = vmatpush3.bf16.msra.mxu0 %v956_v55 }
 0x172   :  { %958 = vmatprep.subr.bf16.mxu0 %v1025_v37 }
 0x175   :  { %960 = vmatpush3.bf16.msra.mxu0 %v959_v59 }
 0x213   :  { %v856_v60 = vpop.f32.mrb[0].mxu1 }
 0x214   :  { %v554_v61 = vmul.f32 %v856_v60, %v856_v60  ;;  %v501_v62 = vpop.f32.mrb[1].mxu1 }
 0x215   :  { %v540_v0 = vadd.f32 %v856_v60, %v501_v62  ;;  %v553_v1 = vmul.f32 %v501_v62, %v501_v62 }
 0x217   :  { %v561_v2 = vadd.f32 %v554_v61, %v553_v1  ;;  %v753_v61 = vld [vmem:[%s1226_s4] ss:$0 sm:$0xff] }
 0x218   :  { %v612_v1 = vmul.f32 0.0, %v753_v61 }
 0x21f   :  { %v859_v3 = vpop.f32.mrb[2].mxu1 }
 0x220   :  { %v511_v4 = vpop.f32.mrb[3].mxu1  ;;  %v556_v8 = vmul.f32 %v859_v3, %v859_v3 }
 0x221   :  { %v541_v5 = vadd.f32 %v540_v0, %v511_v4  ;;  %v555_v7 = vmul.f32 %v511_v4, %v511_v4 }
 0x223   :  { %v562_v9 = vadd.f32 %v561_v2, %v555_v7  ;;  %v542_v10 = vadd.f32 %v859_v3, %v541_v5 }
 0x225   :  { %v563_v11 = vadd.f32 %v562_v9, %v556_v8 }
 0x22b   :  { %v862_v12 = vpop.f32.mrb[4].mxu1 }
 0x22c   :  { %v521_v14 = vpop.f32.mrb[5].mxu1  ;;  %v558_v34 = vmul.f32 %v862_v12, %v862_v12 }
 0x22d   :  { %v543_v15 = vadd.f32 %v542_v10, %v521_v14  ;;  %v557_v16 = vmul.f32 %v521_v14, %v521_v14 }
 0x22f   :  { %v564_v17 = vadd.f32 %v563_v11, %v557_v16  ;;  %v544_v18 = vadd.f32 %v862_v12, %v543_v15 }
 0x231   :  { %v565_v19 = vadd.f32 %v564_v17, %v558_v34 }
 0x237   :  { %v865_v21 = vpop.f32.mrb[6].mxu1 }
 0x238   :  { %v531_v22 = vpop.f32.mrb[7].mxu1  ;;  %v560_v26 = vmul.f32 %v865_v21, %v865_v21 }
 0x239   :  { %v545_v23 = vadd.f32 %v544_v18, %v531_v22  ;;  %v559_v24 = vmul.f32 %v531_v22, %v531_v22 }
 0x23b   :  { %v546_v27 = vadd.f32 %v865_v21, %v545_v23  ;;  %v566_v28 = vadd.f32 %v565_v19, %v559_v24 }
 0x23d   :  { %v547_v29 = vrot.slane %v546_v27, 4  ;;  %v567_v30 = vadd.f32 %v566_v28, %v560_v26 }
 0x23f   :  { %v548_v32 = vadd.f32 %v547_v29, %v546_v27  ;;  %v568_v33 = vrot.slane %v567_v30, 4 }
 0x241   :  { %v549_v36 = vrot.slane %v548_v32, 2  ;;  %v569_v37 = vadd.f32 %v568_v33, %v567_v30 }
 0x243   :  { %v550_v38 = vadd.f32 %v549_v36, %v548_v32  ;;  %v570_v39 = vrot.slane %v569_v37, 2 }
 0x245   :  { %v551_v40 = vrot.slane %v550_v38, 1  ;;  %v571_v41 = vadd.f32 %v570_v39, %v569_v37 }
 0x247   :  { %v552_v31 = vadd.f32 %v551_v40, %v550_v38  ;;  %v572_v42 = vrot.slane %v571_v41, 1 }
 0x249   :  { %v573_v43 = vadd.f32 %v572_v42, %v571_v41  ;;  %v574_v44 = vmul.f32 0.0625, %v552_v31 }
 0x24b   :  { %v575_v45 = vmul.f32 0.0625, %v573_v43  ;;  %v576_v46 = vmul.f32 %v574_v44, %v574_v44  ;;  %v581_v47 = vsub.f32 %v501_v62, %v574_v44  ;;  %v582_v48 = vsub.f32 %v856_v60, %v574_v44 }
 0x24c   :  { %v583_v50 = vsub.f32 %v511_v4, %v574_v44  ;;  %v584_v51 = vsub.f32 %v859_v3, %v574_v44  ;;  %v585_v52 = vsub.f32 %v521_v14, %v574_v44  ;;  %v586_v53 = vsub.f32 %v862_v12, %v574_v44 }
 0x24d   :  { %v577_v54 = vsub.f32 %v575_v45, %v576_v46  ;;  %v587_v55 = vsub.f32 %v531_v22, %v574_v44  ;;  %v588_v57 = vsub.f32 %v865_v21, %v574_v44 }
 0x24f   :  { %v578_v58 = vmax.f32 %v577_v54, 0.0 }
 0x251   :  { %v579_v59 = vadd.f32 1e-05, %v578_v58 }
 0x253   :  { %970 = vrsqrt.f32 %v579_v59 }
 0x25d   :  { %v971_v0 = vpop.eup %970 }
 0x25e   :  { %v589_v2 = vmul.f32 %v971_v0, %v581_v47  ;;  %v590_v5 = vmul.f32 %v971_v0, %v582_v48  ;;  %v591_v62 = vmul.f32 %v971_v0, %v583_v50  ;;  %v592_v60 = vmul.f32 %v971_v0, %v584_v51 }
 0x25f   :  { %v593_v4 = vmul.f32 %v971_v0, %v585_v52  ;;  %v594_v3 = vmul.f32 %v971_v0, %v586_v53  ;;  %v595_v7 = vmul.f32 %v971_v0, %v587_v55  ;;  %v596_v8 = vmul.f32 %v971_v0, %v588_v57 }
 0x260   :  { %v597_v9 = vmul.f32 %v1165_v35, %v589_v2  ;;  %v598_v12 = vmul.f32 %v1170_v49, %v590_v5  ;;  %v599_v34 = vmul.f32 %v1175_v56, %v591_v62  ;;  %v600_v21 = vmul.f32 %v1180_v63, %v592_v60 }
 0x261   :  { %v601_v26 = vmul.f32 %v1185_v6, %v593_v4  ;;  %v602_v49 = vmul.f32 %v1190_v13, %v594_v3  ;;  %v603_v56 = vmul.f32 %v1195_v20, %v595_v7  ;;  %v604_v63 = vmul.f32 %v1200_v25, %v596_v8  ;;  %v754_v6 = vld [vmem:[%s1228_s6] ss:$0 sm:$0xff] }
 0x262   :  { %v613_v10 = vadd.f32 %v612_v1, %v597_v9 }
 0x264   :  { %v614_v11 = vmax.f32 %v613_v10, 0.0 }
 0x266   :  { %v615_v14 = vmul.f32 %v753_v61, %v614_v11 }
 0x268   :  { %v616_v15 = vadd.f32 %v615_v14, %v598_v12 }
 0x26a   :  { %v617_v16 = vmax.f32 %v616_v15, 0.0 }
 0x26c   :  { %v618_v17 = vmul.f32 %v753_v61, %v617_v16 }
 0x26e   :  { %v619_v18 = vadd.f32 %v618_v17, %v599_v34 }
 0x270   :  { %v620_v19 = vmax.f32 %v619_v18, 0.0 }
 0x272   :  { %v621_v22 = vmul.f32 %v753_v61, %v620_v19 }
 0x274   :  { %v622_v23 = vadd.f32 %v621_v22, %v600_v21 }
 0x276   :  { %v623_v24 = vmax.f32 %v622_v23, 0.0 }
 0x278   :  { %v624_v35 = vmul.f32 %v753_v61, %v623_v24 }
 0x27a   :  { %v625_v27 = vadd.f32 %v624_v35, %v601_v26 }
 0x27c   :  { %v626_v28 = vmax.f32 %v625_v27, 0.0 }
 0x27e   :  { %v627_v29 = vmul.f32 %v753_v61, %v626_v28 }
 0x280   :  { %v628_v30 = vadd.f32 %v627_v29, %v602_v49 }
 0x282   :  { %v629_v32 = vmax.f32 %v628_v30, 0.0 }
 0x284   :  { %v630_v33 = vmul.f32 %v753_v61, %v629_v32 }
 0x286   :  { %v631_v36 = vadd.f32 %v630_v33, %v603_v56 }
 0x288   :  { %v632_v37 = vmax.f32 %v631_v36, 0.0 }
 0x28a   :  { %v633_v38 = vmul.f32 %v753_v61, %v632_v37 }
 0x28c   :  { %v634_v39 = vadd.f32 %v633_v38, %v604_v63 }
 0x28e   :  { %v635_v40 = vmax.f32 %v634_v39, 0.0 }
 0x290   :  { %899 = vmatmul.mubr.f32.vlgmr.msra.gmra.mrb[8].mxu0 %v635_v40 }
 0x363   :  { %v725_v41 = vpop.f32.mrb[8].mxu0 }
 0x364   :  { %v726_v13 = vadd.f32 %v754_v6, %v725_v41  ;;  %v900_v31 = vpop.f32.mrb[9].mxu0 }
 0x366   :  { %729 = vst [vmem:[%s1229_s7] sm:$0xff] %v726_v13 }
 0x367   :  { %734 = vsyncpa [#allocation3], 1 }
 0x368   :  { %735 = vsyncpa [#allocation5], 1 }

</bundles_post_ra>
